<compile_context>
chip_gen: v5e
topology: v5e:2x2
jax: 0.10.0
libtpu: 0.0.40
codegen_flags: <defaults>
</compile_context>

<pallas_src>
import functools

import jax
import jax.numpy as jnp
from jax import lax
from jax.experimental import pallas as pl
from jax.experimental.pallas import tpu as pltpu

K = 4          # number of tokens selected per row
TAU = 0.5      # softmax temperature for the relaxed selection
EPS = 1e-12
NEG_INF = -1e30

_TILE_BYTES_BUDGET = 2 * 1024 * 1024   # target per-step f32 tile footprint
_VMEM_LIMIT_BYTES = 48 * 1024 * 1024   # safe on v5e/v6e (128 MiB) and v7x (64 MiB)


# --------------------------------------------------------------------------
# Kernel 1: differentiable (soft) top-k   — used when training=True
# --------------------------------------------------------------------------
def _soft_topk_kernel(logits_ref, out_ref, *, k: int, tau: float):
    """Relaxed top-k with a single full-tile transcendental.

    exp((x + sum_s log(1-p_s)) / tau) == exp(x/tau) * prod_s (1-p_s)^(1/tau),
    so we compute e0 = exp((x - rowmax) * inv_tau) once and keep a running
    multiplicative suppression gate g.  For integer 1/tau the gate power is
    just repeated VPU multiplies (tau=0.5 -> one square).
    """
    inv_tau = 1.0 / tau
    x = logits_ref[...].astype(jnp.float32)                 # (TB, S)
    m = jnp.max(x, axis=-1, keepdims=True)
    e0 = jnp.exp((x - m) * inv_tau)        # the only full-tile EUP op
    g = jnp.ones_like(e0)                  # running gate: prod (1-p_s)^(1/tau)
    khot = jnp.zeros_like(e0)

    int_pow = (int(inv_tau)
               if float(inv_tau).is_integer() and 1.0 <= inv_tau <= 8.0
               else None)

    # k is a small static constant -> unrolled loop is fine for the scheduler.
    for it in range(k):
        e = e0 * g
        denom = jnp.sum(e, axis=-1, keepdims=True)          # (TB, 1) lane-sum
        onehot = e * pl.reciprocal(denom, approx=True)
        khot = khot + onehot
        if it + 1 < k:                                       # last gate unused
            gate = jnp.maximum(1.0 - onehot, EPS)
            if int_pow is not None:
                p = gate
                for _ in range(int_pow - 1):
                    p = p * gate                             # gate ** (1/tau)
            else:
                p = jnp.exp(inv_tau * jnp.log(gate))         # generic tau
            g = g * p
    out_ref[...] = khot.astype(out_ref.dtype)


# --------------------------------------------------------------------------
# Kernel 2: hard top-k indicator mask     — used when training=False
# --------------------------------------------------------------------------
def _hard_topk_kernel(logits_ref, out_ref, *, k: int):
    x = logits_ref[...].astype(jnp.float32)                  # (TB, S)
    S = x.shape[-1]
    idx = lax.broadcasted_iota(jnp.int32, x.shape, dimension=x.ndim - 1)
    khot = jnp.zeros_like(x)
    work = x
    # NOTE: an exact single-reduction fuse of (max value, min index) needs >32-bit
    # keys, so we keep two XLU lane reductions per iteration (eval path only).
    for _ in range(k):
        m = jnp.max(work, axis=-1, keepdims=True)
        is_max = work >= m
        # tie-break: pick smallest index among maxima (matches torch.topk order)
        first = jnp.min(jnp.where(is_max, idx, S), axis=-1, keepdims=True)
        onehot = (idx == first).astype(jnp.float32)
        khot = khot + onehot
        work = jnp.where(onehot > 0, NEG_INF, work)
    out_ref[...] = khot.astype(out_ref.dtype)


# --------------------------------------------------------------------------
# Wrappers (pallas_call glue)
# --------------------------------------------------------------------------
def _choose_tile_b(B: int, S: int) -> int:
    """Largest sublane-aligned divisor of B within the per-step VMEM budget,
    preferring >=2 grid steps so both v7x TensorCores get work."""
    row_bytes = S * 4  # f32 compute
    cap = max(8, (_TILE_BYTES_BUDGET // row_bytes) // 8 * 8)
    cands = [d for d in range(8, min(B, cap) + 1, 8) if B % d == 0]
    if B <= cap:
        cands.append(B)          # full-array block is always layout-legal
    if not cands:
        return B                 # odd/huge batch: single full block
    multi = [d for d in cands if B // d >= 2]
    return max(multi) if multi else max(cands)


def _run(kernel_fn, logits, *, flops: int, transcendentals: int):
    B, S = logits.shape
    tile_b = _choose_tile_b(B, S)
    grid = (pl.cdiv(B, tile_b),)
    itemsize = jnp.dtype(logits.dtype).itemsize
    cost = pl.CostEstimate(
        flops=int(flops),
        transcendentals=int(transcendentals),
        bytes_accessed=int(2 * B * S * itemsize),   # read + write
    )
    return pl.pallas_call(
        kernel_fn,
        out_shape=jax.ShapeDtypeStruct((B, S), logits.dtype),
        grid_spec=pl.GridSpec(
            grid=grid,
            in_specs=[pl.BlockSpec((tile_b, S), lambda i: (i, 0))],
            out_specs=pl.BlockSpec((tile_b, S), lambda i: (i, 0)),
        ),
        compiler_params=pltpu.CompilerParams(
            dimension_semantics=("parallel",),
            vmem_limit_bytes=_VMEM_LIMIT_BYTES,
        ),
        cost_estimate=cost,
    )(logits)


@functools.partial(jax.jit, static_argnames=("k", "tau"))
def soft_select_k(logits, *, k=K, tau=TAU):
    B, S = logits.shape
    return _run(functools.partial(_soft_topk_kernel, k=k, tau=tau),
                logits, flops=B * S * (4 + 6 * k), transcendentals=B * S)


@functools.partial(jax.jit, static_argnames=("k",))
def hard_select_k(logits, *, k=K):
    B, S = logits.shape
    return _run(functools.partial(_hard_topk_kernel, k=k),
                logits, flops=B * S * 5 * k, transcendentals=0)


class DifferentiableSelectKModel:
    """JAX/Pallas port of the PyTorch dispatcher module."""

    def __init__(self, diff_fun, fun):
        self.diff_fun = diff_fun
        self.fun = fun
        self.training = True

    def train(self):
        self.training = True
        return self

    def eval(self):
        self.training = False
        return self

    def __call__(self, logits):
        return self.diff_fun(logits) if self.training else self.fun(logits)


# --------------------------------------------------------------------------
# Pure-JAX reference of the original (per-iteration log/exp) soft top-k
# --------------------------------------------------------------------------
def _soft_ref(x, k=K, tau=TAU):
    x = x.astype(jnp.float32)
    khot = jnp.zeros_like(x)
    onehot = jnp.zeros_like(x)
    cur = x
    for _ in range(k):
        cur = cur + jnp.log(jnp.maximum(1.0 - onehot, EPS))
        onehot = jax.nn.softmax(cur / tau, axis=-1)
        khot = khot + onehot
    return khot


if __name__ == "__main__":
    # deterministic inputs: batch=8 rows of seq=128 logits
    key = jax.random.PRNGKey(0)
    logits = jax.random.normal(key, (8, 128), dtype=jnp.float32)

    model = DifferentiableSelectKModel(soft_select_k, hard_select_k)

    # training mode -> differentiable soft top-k
    model.train()
    soft_mask = model(logits)
    jax.block_until_ready(soft_mask)

    # eval mode -> hard top-k indicator
    model.eval()
    hard_mask = model(logits)
    jax.block_until_ready(hard_mask)

    # sanity checks against pure-JAX references
    assert soft_mask.shape == logits.shape and hard_mask.shape == logits.shape
    # soft mask rows should each sum to ~K (approx reciprocal -> loose tol)
    assert bool(jnp.all(jnp.abs(jnp.sum(soft_mask, axis=-1) - K) < 5e-2))
    # soft mask should match the original per-iteration-exp formulation
    assert bool(jnp.max(jnp.abs(soft_mask - _soft_ref(logits))) < 5e-2)
    # hard mask must be exactly K ones per row, at the top-K logit positions
    assert bool(jnp.all(jnp.sum(hard_mask, axis=-1) == K))
    topk_idx = jax.lax.top_k(logits, K)[1]
    ref_hard = jnp.zeros_like(logits).at[
        jnp.arange(logits.shape[0])[:, None], topk_idx].set(1.0)
    assert bool(jnp.all(hard_mask == ref_hard))

    print("KERNEL_OK")
</pallas_src>

<mosaic_0001>
module attributes {stable_mosaic.version = 11 : i64} {
  func.func @_soft_topk_kernel(%arg0: i32, %arg1: memref<8x128xf32, #tpu.memory_space<vmem>>, %arg2: memref<8x128xf32, #tpu.memory_space<vmem>>) attributes {dimension_semantics = [#tpu.dimension_semantics<parallel>], iteration_bounds = array<i64: 1>, scalar_prefetch = 0 : i64, scratch_operands = 0 : i64, tpu.core_type = #tpu.core_type<tc>, window_params = [{transform_indices = @transform_0, window_bounds = array<i64: 8, 128>}, {transform_indices = @transform_1, window_bounds = array<i64: 8, 128>}]} {
    %c0 = arith.constant 0 : index
    %c0_0 = arith.constant 0 : index
    %0 = vector.load %arg1[%c0, %c0_0] : memref<8x128xf32, #tpu.memory_space<vmem>>, vector<8x128xf32>
    %cst = arith.constant dense<0xFF800000> : vector<8xf32>
    %1 = vector.multi_reduction <maximumf>, %0, %cst [1] : vector<8x128xf32> to vector<8xf32>
    %2 = vector.shape_cast %1 : vector<8xf32> to vector<8x1xf32>
    %3 = vector.broadcast %2 : vector<8x1xf32> to vector<8x128xf32>
    %4 = arith.subf %0, %3 : vector<8x128xf32>
    %cst_1 = arith.constant 2.000000e+00 : f32
    %5 = vector.broadcast %cst_1 : f32 to vector<8x128xf32>
    %6 = arith.mulf %4, %5 : vector<8x128xf32>
    %7 = math.exp %6 : vector<8x128xf32>
    %cst_2 = arith.constant 1.000000e+00 : f32
    %8 = vector.broadcast %cst_2 : f32 to vector<8x128xf32>
    %cst_3 = arith.constant 0.000000e+00 : f32
    %9 = vector.broadcast %cst_3 : f32 to vector<8x128xf32>
    %10 = arith.mulf %7, %8 : vector<8x128xf32>
    %cst_4 = arith.constant dense<0.000000e+00> : vector<8xf32>
    %11 = vector.multi_reduction <add>, %10, %cst_4 [1] : vector<8x128xf32> to vector<8xf32>
    %12 = vector.shape_cast %11 : vector<8xf32> to vector<8x1xf32>
    %13 = tpu.reciprocal %12 {approx = true} : vector<8x1xf32> -> vector<8x1xf32>
    %14 = vector.broadcast %13 : vector<8x1xf32> to vector<8x128xf32>
    %15 = arith.mulf %10, %14 : vector<8x128xf32>
    %16 = arith.addf %9, %15 : vector<8x128xf32>
    %cst_5 = arith.constant 1.000000e+00 : f32
    %17 = vector.broadcast %cst_5 : f32 to vector<8x128xf32>
    %18 = arith.subf %17, %15 : vector<8x128xf32>
    %cst_6 = arith.constant 9.99999996E-13 : f32
    %19 = vector.broadcast %cst_6 : f32 to vector<8x128xf32>
    %20 = arith.maximumf %18, %19 : vector<8x128xf32>
    %21 = arith.mulf %20, %20 : vector<8x128xf32>
    %22 = arith.mulf %8, %21 : vector<8x128xf32>
    %23 = arith.mulf %7, %22 : vector<8x128xf32>
    %cst_7 = arith.constant dense<0.000000e+00> : vector<8xf32>
    %24 = vector.multi_reduction <add>, %23, %cst_7 [1] : vector<8x128xf32> to vector<8xf32>
    %25 = vector.shape_cast %24 : vector<8xf32> to vector<8x1xf32>
    %26 = tpu.reciprocal %25 {approx = true} : vector<8x1xf32> -> vector<8x1xf32>
    %27 = vector.broadcast %26 : vector<8x1xf32> to vector<8x128xf32>
    %28 = arith.mulf %23, %27 : vector<8x128xf32>
    %29 = arith.addf %16, %28 : vector<8x128xf32>
    %cst_8 = arith.constant 1.000000e+00 : f32
    %30 = vector.broadcast %cst_8 : f32 to vector<8x128xf32>
    %31 = arith.subf %30, %28 : vector<8x128xf32>
    %cst_9 = arith.constant 9.99999996E-13 : f32
    %32 = vector.broadcast %cst_9 : f32 to vector<8x128xf32>
    %33 = arith.maximumf %31, %32 : vector<8x128xf32>
    %34 = arith.mulf %33, %33 : vector<8x128xf32>
    %35 = arith.mulf %22, %34 : vector<8x128xf32>
    %36 = arith.mulf %7, %35 : vector<8x128xf32>
    %cst_10 = arith.constant dense<0.000000e+00> : vector<8xf32>
    %37 = vector.multi_reduction <add>, %36, %cst_10 [1] : vector<8x128xf32> to vector<8xf32>
    %38 = vector.shape_cast %37 : vector<8xf32> to vector<8x1xf32>
    %39 = tpu.reciprocal %38 {approx = true} : vector<8x1xf32> -> vector<8x1xf32>
    %40 = vector.broadcast %39 : vector<8x1xf32> to vector<8x128xf32>
    %41 = arith.mulf %36, %40 : vector<8x128xf32>
    %42 = arith.addf %29, %41 : vector<8x128xf32>
    %cst_11 = arith.constant 1.000000e+00 : f32
    %43 = vector.broadcast %cst_11 : f32 to vector<8x128xf32>
    %44 = arith.subf %43, %41 : vector<8x128xf32>
    %cst_12 = arith.constant 9.99999996E-13 : f32
    %45 = vector.broadcast %cst_12 : f32 to vector<8x128xf32>
    %46 = arith.maximumf %44, %45 : vector<8x128xf32>
    %47 = arith.mulf %46, %46 : vector<8x128xf32>
    %48 = arith.mulf %35, %47 : vector<8x128xf32>
    %49 = arith.mulf %7, %48 : vector<8x128xf32>
    %cst_13 = arith.constant dense<0.000000e+00> : vector<8xf32>
    %50 = vector.multi_reduction <add>, %49, %cst_13 [1] : vector<8x128xf32> to vector<8xf32>
    %51 = vector.shape_cast %50 : vector<8xf32> to vector<8x1xf32>
    %52 = tpu.reciprocal %51 {approx = true} : vector<8x1xf32> -> vector<8x1xf32>
    %53 = vector.broadcast %52 : vector<8x1xf32> to vector<8x128xf32>
    %54 = arith.mulf %49, %53 : vector<8x128xf32>
    %55 = arith.addf %42, %54 : vector<8x128xf32>
    %c0_14 = arith.constant 0 : index
    %c0_15 = arith.constant 0 : index
    %56 = vector.load %arg2[%c0_14, %c0_15] : memref<8x128xf32, #tpu.memory_space<vmem>>, vector<8x128xf32>
    tpu.vector_store %arg2[%c0_14, %c0_15], %55 {strides = array<i32>} : memref<8x128xf32, #tpu.memory_space<vmem>>, vector<8x128xf32>,
    return
  }
  func.func @transform_0(%arg0: i32) -> (i32, i32) {
    %c0_i32 = arith.constant 0 : i32
    %c0_i32_0 = arith.constant 0 : i32
    return %arg0, %c0_i32 : i32, i32
  }
  func.func @transform_1(%arg0: i32) -> (i32, i32) {
    %c0_i32 = arith.constant 0 : i32
    %c0_i32_0 = arith.constant 0 : i32
    return %arg0, %c0_i32 : i32, i32
  }
}

</mosaic_0001>

<bundles_post_ra>
// kernel: soft_select_k.1
= control target key start
LH: loop header
LB: loop body
LE: loop exit
PB: predicated region body
PF: predicated region fallthrough
CT: control target
= control target key end

     0   :  { %6 = vsyncpa [#allocation3], 0  ;;  %s164_s0 = inlined_call_operand.hbm [shape: f32[8,128], index: 0, kind: input, shape index: {}]   ;;  %s165_s1 = inlined_call_operand.hbm [shape: f32[8,128], index: 1, kind: output, shape index: {}]  }
   0x1   :  { %7 = vsyncpa [#allocation4], 0  ;;  %s13_s8 = sshll.u32 %s164_s0, 4  ;;  %s146_s9 = smov [#allocation2]   ;;  %s14_s8 = int_to_ptr.hbm [resolvable:$true] %s13_s8 }
   0x2   :  { %s15_s10 = sshll.u32 %s146_s9, 4  ;;  %s16_s10 = int_to_ptr.vmem [resolvable:$true] %s15_s10 }
   0x3   :  { %18 = dma.hbm_to_vmem [thread:$0]  %s14_s8, 128, %s16_s10, [#allocation3]  }
   0x4   :  { %142 = dma.done.wait [#allocation3], 128  }
   0x5   :  { %143 = vsyncadd [#allocation3], 4294967168  ;;  %v23_v0 = vld [vmem:[#allocation2] sm:$0xff]  ;;  %s147_s0 = smov [#allocation5]   ;;  %s72_s14 = sshll.u32 %s165_s1, 4  ;;  %s73_s14 = int_to_ptr.hbm [resolvable:$true] %s72_s14 }
   0x6   :  { %24 = vmax.xlane.f32.xlu0 %v23_v0  ;;  %s70_s11 = sshll.u32 %s147_s0, 4  ;;  %s71_s11 = int_to_ptr.vmem [resolvable:$true] %s70_s11 }
  0x79   :  { %v25_v1 = vpop.xlane.xlu0 %24 }
  0x7a   :  { %v26_v2 = vsub.f32 %v23_v0, %v25_v1 }
  0x7c   :  { %v27_v3 = vmul.f32 2.0, %v26_v2 }
  0x7e   :  { %v28_v4 = vmul.f32 1.442695, %v27_v3 }
  0x80   :  { %84 = vpow2.f32 %v28_v4 }
  0x86   :  { %v85_v5 = vpop.eup %84 }
  0x87   :  { %30 = vadd.xlane.f32.xlu0 %v85_v5 }
  0xfa   :  { %v31_v6 = vpop.xlane.xlu0 %30 }
  0xfb   :  { %86 = vrcp.f32 %v31_v6 }
 0x101   :  { %v87_v7 = vpop.eup %86 }
 0x102   :  { %v33_v8 = vmul.f32 %v87_v7, %v85_v5 }
 0x104   :  { %v35_v9 = vsub.f32 1.0, %v33_v8 }
 0x106   :  { %v36_v10 = vmax.f32 %v35_v9, 1e-12 }
 0x108   :  { %v37_v11 = vmul.f32 %v36_v10, %v36_v10 }
 0x10a   :  { %v38_v12 = vmul.f32 %v85_v5, %v37_v11 }
 0x10c   :  { %39 = vadd.xlane.f32.xlu1 %v38_v12 }
 0x17f   :  { %v40_v13 = vpop.xlane.xlu1 %39 }
 0x180   :  { %88 = vrcp.f32 %v40_v13 }
 0x186   :  { %v89_v14 = vpop.eup %88 }
 0x187   :  { %v42_v15 = vmul.f32 %v89_v14, %v38_v12 }
 0x189   :  { %v44_v16 = vsub.f32 1.0, %v42_v15  ;;  %v43_v24 = vadd.f32 %v42_v15, %v33_v8 }
 0x18b   :  { %v45_v17 = vmax.f32 %v44_v16, 1e-12 }
 0x18d   :  { %v46_v18 = vmul.f32 %v45_v17, %v45_v17 }
 0x18f   :  { %v47_v19 = vmul.f32 %v46_v18, %v37_v11 }
 0x191   :  { %v48_v20 = vmul.f32 %v85_v5, %v47_v19 }
 0x193   :  { %49 = vadd.xlane.f32.xlu1 %v48_v20 }
 0x206   :  { %v50_v21 = vpop.xlane.xlu1 %49 }
 0x207   :  { %90 = vrcp.f32 %v50_v21 }
 0x20d   :  { %v91_v22 = vpop.eup %90 }
 0x20e   :  { %v52_v23 = vmul.f32 %v91_v22, %v48_v20 }
 0x210   :  { %v54_v25 = vsub.f32 1.0, %v52_v23  ;;  %v53_v26 = vadd.f32 %v52_v23, %v43_v24 }
 0x212   :  { %v55_v27 = vmax.f32 %v54_v25, 1e-12 }
 0x214   :  { %v56_v28 = vmul.f32 %v55_v27, %v55_v27 }
 0x216   :  { %v57_v29 = vmul.f32 %v56_v28, %v47_v19 }
 0x218   :  { %v58_v30 = vmul.f32 %v85_v5, %v57_v29 }
 0x21a   :  { %59 = vadd.xlane.f32.xlu2 %v58_v30 }
 0x28d   :  { %v60_v31 = vpop.xlane.xlu2 %59 }
 0x28e   :  { %92 = vrcp.f32 %v60_v31 }
 0x294   :  { %v93_v32 = vpop.eup %92 }
 0x295   :  { %v62_v33 = vmul.f32 %v93_v32, %v58_v30 }
 0x297   :  { %v63_v34 = vadd.f32 %v62_v33, %v53_v26 }
 0x299   :  { %64 = vst [vmem:[#allocation5] sm:$0xff] %v63_v34 }
 0x29a   :  { %75 = dma.vmem_to_hbm [thread:$0]  %s71_s11, 128, %s73_s14, [#allocation4]  }
 0x29b   :  { %144 = dma.done.wait [#allocation4], 128  }
 0x29c   :  { %145 = vsyncadd [#allocation4], 4294967168 }
 0x29d   :  { %80 = vsyncpa [#allocation3], 1 }
 0x29e   :  { %81 = vsyncpa [#allocation4], 1 }

</bundles_post_ra>
